<compile_context>
chip_gen: v7x
topology: tpu7x:2x2x1
jax: 0.10.0
libtpu: 0.0.40
codegen_flags: <defaults>
</compile_context>

<pallas_src>
import functools

import jax
import jax.numpy as jnp
from jax.experimental import pallas as pl
from jax.experimental.pallas import tpu as pltpu


def tcn_kernel(x_ref, w1_ref, b1_ref, w2_ref, b2_ref, wl_ref, bl_ref, o_ref,
               *, seq_len, c1, c2, conv1_im2col):
    # x_ref : (M, Cin)  f32, M = bb * seq_len (batch folded into rows)
    # w1_ref: (3*Cin, C1) bf16 (im2col)  or  (Cin, 3*C1) bf16 (output concat)
    # b1_ref: (1, C1) f32
    # w2_ref: (C1, 3*C2) bf16   taps [prev | center | next] along lanes
    # b2_ref: (1, C2) f32
    # wl_ref: (C2, 128) f32   classifier weight, lane-padded
    # bl_ref: (1, 128)  f32   classifier bias, lane-padded
    # o_ref : (bb, 128) f32   lane-padded logits per folded sequence
    x = x_ref[...].astype(jnp.bfloat16)          # cast on the VPU (free under MXU slack)
    m = x.shape[0]

    # Position of each folded row inside its own sequence.  Edge taps are
    # masked here, which is what makes the batch-fold + shift trick exact:
    # every grid chunk covers whole sequences, so padded / neighbouring
    # sequences can never leak into valid rows.
    t_pos = jax.lax.broadcasted_iota(jnp.int32, (m, 1), 0) % seq_len
    first = t_pos == 0
    last = t_pos == (seq_len - 1)

    def shift_down(v):
        # row t <- v[t-1]; rows with t_pos == 0 <- 0   (left zero pad of the conv)
        zero_row = jnp.zeros((1, v.shape[1]), v.dtype)
        s = jnp.concatenate([zero_row, v[:-1, :]], axis=0)
        return jnp.where(first, jnp.zeros_like(s), s)

    def shift_up(v):
        # row t <- v[t+1]; rows with t_pos == seq_len-1 <- 0  (right zero pad)
        zero_row = jnp.zeros((1, v.shape[1]), v.dtype)
        s = jnp.concatenate([v[1:, :], zero_row], axis=0)
        return jnp.where(last, jnp.zeros_like(s), s)

    # ---- conv1 (Cin -> C1, k=3, pad=1) + ReLU -------------------------------
    if conv1_im2col:
        # K = 3*Cin fills the 256-deep MXU of v6e/v7x (~75% vs ~50% at K=Cin).
        lhs = jnp.concatenate([shift_down(x), x, shift_up(x)], axis=1)   # (M, 3*Cin)
        z = jnp.dot(lhs, w1_ref[...], preferred_element_type=jnp.float32)
        h = jnp.maximum(z + b1_ref[...], 0.0)
    else:
        # One matmul against the 3 taps concatenated along the output axis,
        # then shift the *outputs*.  (<= v5: K = Cin already fills the MXU.)
        z = jnp.dot(x, w1_ref[...], preferred_element_type=jnp.float32)  # (M, 3*C1)
        h = jnp.maximum(shift_down(z[:, :c1]) + z[:, c1:2 * c1]
                        + shift_up(z[:, 2 * c1:]) + b1_ref[...], 0.0)
    h = h.astype(jnp.bfloat16)                                           # (M, C1)

    # ---- conv2 (C1 -> C2, k=3, pad=1) + ReLU : output-side tap concat -------
    z = jnp.dot(h, w2_ref[...], preferred_element_type=jnp.float32)      # (M, 3*C2)
    g = jnp.maximum(shift_down(z[:, :c2]) + z[:, c2:2 * c2]
                    + shift_up(z[:, 2 * c2:]) + b2_ref[...], 0.0)        # (M, C2) f32

    # ---- AdaptiveAvgPool1d(1): mean over time within each folded sequence ---
    # seq_len is a multiple of 8 here, so this sublane split is a clean
    # untile; for other T an explicit strided accumulation would avoid a
    # Mosaic relayout.
    bb = m // seq_len
    pooled = jnp.mean(g.reshape(bb, seq_len, c2), axis=1)                # (bb, C2)

    # ---- classifier folded in (lane-padded to 128 outputs, f32 on the MXU) --
    o_ref[...] = (jnp.dot(pooled, wl_ref[...],
                          preferred_element_type=jnp.float32) + bl_ref[...])


def _use_conv1_im2col():
    """K=3*Cin im2col for conv1 on 256-deep-MXU chips (v6e/v7x); K=Cin on <=v5."""
    try:
        kind = jax.devices()[0].device_kind.lower()
    except Exception:
        return True
    return not any(tag in kind for tag in ("v2", "v3", "v4", "v5"))


def _choose_tiling(batch, seq_len, target_rows=512):
    """Sequences per grid chunk (bb) and the padded batch size.

    Targets ~target_rows folded rows per chunk so grid-step overhead
    (~0.35 us) and MXU weight pushes are amortised; keeps the (bb, 128)
    output block sublane-aligned; pads the batch up to a multiple of bb
    instead of collapsing into one huge block when no aligned divisor
    exists.  Real batch sizes naturally give >= 2 chunks so v7x can shard
    the parallel axis over both TensorCores.
    """
    bb = max(1, target_rows // seq_len)
    if bb >= batch:
        return batch, batch                       # one chunk holds everything
    bb = max(8, (bb // 8) * 8)                    # output block needs bb % 8 == 0
    padded = ((batch + bb - 1) // bb) * bb
    return bb, padded


def temporal_conv_net(x, torch_params, *, target_rows=512):
    """x: (B, T, Cin) float32. torch_params in PyTorch layouts:
       w1 (C1, Cin, 3), b1 (C1,), w2 (C2, C1, 3), b2 (C2,), wl (NC, C2), bl (NC,)."""
    w1_t, b1, w2_t, b2, wl_t, bl = torch_params
    B, T, Cin = x.shape
    C1 = w1_t.shape[0]
    C2 = w2_t.shape[0]
    NC = wl_t.shape[0]
    LANES = 128

    im2col = _use_conv1_im2col()
    if im2col:
        # rows stacked as [w[:,:,0].T ; w[:,:,1].T ; w[:,:,2].T]  -> (3*Cin, C1)
        w1_k = jnp.transpose(w1_t, (2, 1, 0)).reshape(3 * Cin, C1).astype(jnp.bfloat16)
    else:
        # taps concatenated along the output axis                  -> (Cin, 3*C1)
        w1_k = jnp.transpose(w1_t, (1, 2, 0)).reshape(Cin, 3 * C1).astype(jnp.bfloat16)
    w2_k = jnp.transpose(w2_t, (1, 2, 0)).reshape(C1, 3 * C2).astype(jnp.bfloat16)

    # Classifier weight / bias lane-padded to 128 outputs (kept f32).
    wl_pad = jnp.zeros((C2, LANES), jnp.float32).at[:, :NC].set(
        wl_t.T.astype(jnp.float32))
    bl_pad = jnp.zeros((1, LANES), jnp.float32).at[0, :NC].set(
        bl.astype(jnp.float32))

    bb, Bp = _choose_tiling(B, T, target_rows)
    x_flat = x.astype(jnp.float32).reshape(B * T, Cin)   # reshape is free; no cast pass
    if Bp != B:
        x_flat = jnp.pad(x_flat, ((0, (Bp - B) * T), (0, 0)))
    M = bb * T
    n_chunks = Bp // bb

    flops = 2 * Bp * T * (3 * Cin * C1 + 3 * C1 * C2) + 2 * Bp * C2 * LANES
    bytes_accessed = (x_flat.size * 4 + w1_k.size * 2 + w2_k.size * 2
                      + (b1.size + b2.size) * 4
                      + (wl_pad.size + bl_pad.size) * 4 + Bp * LANES * 4)

    out_pad = pl.pallas_call(
        functools.partial(tcn_kernel, seq_len=T, c1=C1, c2=C2,
                          conv1_im2col=im2col),
        out_shape=jax.ShapeDtypeStruct((Bp, LANES), jnp.float32),
        grid_spec=pltpu.PrefetchScalarGridSpec(
            num_scalar_prefetch=0,
            grid=(n_chunks,),
            in_specs=[
                pl.BlockSpec((M, Cin), lambda b: (b, 0)),
                pl.BlockSpec(w1_k.shape, lambda b: (0, 0)),
                pl.BlockSpec((1, C1), lambda b: (0, 0)),
                pl.BlockSpec((C1, 3 * C2), lambda b: (0, 0)),
                pl.BlockSpec((1, C2), lambda b: (0, 0)),
                pl.BlockSpec((C2, LANES), lambda b: (0, 0)),
                pl.BlockSpec((1, LANES), lambda b: (0, 0)),
            ],
            out_specs=pl.BlockSpec((bb, LANES), lambda b: (b, 0)),
        ),
        compiler_params=pltpu.CompilerParams(
            dimension_semantics=("parallel",),
            vmem_limit_bytes=48 * 1024 * 1024),
        cost_estimate=pl.CostEstimate(flops=flops, transcendentals=0,
                                      bytes_accessed=bytes_accessed),
    )(x_flat, w1_k, b1.reshape(1, C1).astype(jnp.float32),
      w2_k, b2.reshape(1, C2).astype(jnp.float32), wl_pad, bl_pad)

    return out_pad[:B, :NC]


def reference(x, torch_params):
    """Pure-JAX mirror of the PyTorch module (NCW Conv1d semantics, f32)."""
    w1_t, b1, w2_t, b2, wl_t, bl = torch_params

    def conv1d_pad1(x_btc, w, b):  # x (B,T,Cin), w (Cout,Cin,3)
        xp = jnp.pad(x_btc, ((0, 0), (1, 1), (0, 0)))
        y = (jnp.einsum('btc,oc->bto', xp[:, :-2], w[:, :, 0])
             + jnp.einsum('btc,oc->bto', xp[:, 1:-1], w[:, :, 1])
             + jnp.einsum('btc,oc->bto', xp[:, 2:], w[:, :, 2]))
        return y + b[None, None, :]

    h = jax.nn.relu(conv1d_pad1(x, w1_t, b1))
    g = jax.nn.relu(conv1d_pad1(h, w2_t, b2))
    pooled = jnp.mean(g, axis=1)
    return pooled @ wl_t.T + bl[None, :]


if __name__ == "__main__":
    # Small shapes consistent with the module (input_size is a ctor argument;
    # C1=256, C2=128, num_classes=3 are hard-coded in the PyTorch module).
    B, T, Cin = 2, 16, 128
    C1, C2, NC = 256, 128, 3

    key = jax.random.PRNGKey(0)
    k = jax.random.split(key, 7)
    x = jax.random.normal(k[0], (B, T, Cin), jnp.float32)

    # PyTorch-layout parameters: conv (Cout, Cin, K), linear (out, in).
    w1_torch = jax.random.normal(k[1], (C1, Cin, 3), jnp.float32) * 0.05
    b1 = jax.random.normal(k[2], (C1,), jnp.float32) * 0.05
    w2_torch = jax.random.normal(k[3], (C2, C1, 3), jnp.float32) * 0.05
    b2 = jax.random.normal(k[4], (C2,), jnp.float32) * 0.05
    wl_torch = jax.random.normal(k[5], (NC, C2), jnp.float32) * 0.05
    bl = jax.random.normal(k[6], (NC,), jnp.float32) * 0.05

    params = (w1_torch, b1, w2_torch, b2, wl_torch, bl)

    out = jax.block_until_ready(temporal_conv_net(x, params))

    # Compare against the f32 reference on the same bf16-rounded x / conv
    # weights the kernel consumes (isolates kernel error from the intentional
    # bf16 MXU casts).
    rnd = lambda a: a.astype(jnp.bfloat16).astype(jnp.float32)
    params_ref = (rnd(w1_torch), b1, rnd(w2_torch), b2, wl_torch, bl)
    ref = reference(rnd(x), params_ref)

    assert out.shape == (B, NC)
    assert jnp.allclose(out, ref, atol=2e-2, rtol=2e-2), "mismatch vs reference"
    print("KERNEL_OK")
</pallas_src>

<mosaic_0001>
module attributes {stable_mosaic.version = 11 : i64} {
  func.func @tcn_kernel(%arg0: i32, %arg1: memref<32x128xf32, #tpu.memory_space<vmem>>, %arg2: memref<384x256xbf16, #tpu.memory_space<vmem>>, %arg3: memref<1x256xf32, #tpu.memory_space<vmem>>, %arg4: memref<256x384xbf16, #tpu.memory_space<vmem>>, %arg5: memref<1x128xf32, #tpu.memory_space<vmem>>, %arg6: memref<128x128xf32, #tpu.memory_space<vmem>>, %arg7: memref<1x128xf32, #tpu.memory_space<vmem>>, %arg8: memref<2x128xf32, #tpu.memory_space<vmem>>) attributes {dimension_semantics = [#tpu.dimension_semantics<parallel>], iteration_bounds = array<i64: 1>, scalar_prefetch = 0 : i64, scratch_operands = 0 : i64, tpu.core_type = #tpu.core_type<tc>, window_params = [{transform_indices = @transform_0, window_bounds = array<i64: 32, 128>}, {pipeline_mode = #tpu.pipeline_mode<synchronous>, transform_indices = @transform_1, window_bounds = array<i64: 384, 256>}, {pipeline_mode = #tpu.pipeline_mode<synchronous>, transform_indices = @transform_2, window_bounds = array<i64: 1, 256>}, {pipeline_mode = #tpu.pipeline_mode<synchronous>, transform_indices = @transform_3, window_bounds = array<i64: 256, 384>}, {pipeline_mode = #tpu.pipeline_mode<synchronous>, transform_indices = @transform_4, window_bounds = array<i64: 1, 128>}, {pipeline_mode = #tpu.pipeline_mode<synchronous>, transform_indices = @transform_5, window_bounds = array<i64: 128, 128>}, {pipeline_mode = #tpu.pipeline_mode<synchronous>, transform_indices = @transform_6, window_bounds = array<i64: 1, 128>}, {transform_indices = @transform_7, window_bounds = array<i64: 2, 128>}]} {
    %c0 = arith.constant 0 : index
    %c0_0 = arith.constant 0 : index
    %0 = vector.load %arg1[%c0, %c0_0] : memref<32x128xf32, #tpu.memory_space<vmem>>, vector<32x128xf32>
    %1 = arith.truncf %0 : vector<32x128xf32> to vector<32x128xbf16>
    %2 = tpu.iota {dimensions = array<i32: 0>} : vector<32x1xi32>
    %c16_i32 = arith.constant 16 : i32
    %c0_i32 = arith.constant 0 : i32
    %3 = arith.cmpi eq, %c16_i32, %c0_i32 : i32
    %c1_i32 = arith.constant 1 : i32
    %4 = arith.select %3, %c1_i32, %c16_i32 : i32
    %5 = vector.broadcast %4 : i32 to vector<32x1xi32>
    %6 = arith.remsi %2, %5 : vector<32x1xi32>
    %c0_i32_1 = arith.constant 0 : i32
    %7 = vector.broadcast %c0_i32_1 : i32 to vector<32x1xi32>
    %8 = arith.cmpi ne, %6, %7 : vector<32x1xi32>
    %c0_i32_2 = arith.constant 0 : i32
    %9 = vector.broadcast %c0_i32_2 : i32 to vector<32x1xi32>
    %10 = arith.cmpi slt, %6, %9 : vector<32x1xi32>
    %c0_i32_3 = arith.constant 0 : i32
    %11 = arith.cmpi slt, %4, %c0_i32_3 : i32
    %12 = vector.broadcast %11 : i1 to vector<32x1xi1>
    %13 = vector.broadcast %12 : vector<32x1xi1> to vector<32x1xi1>
    %14 = arith.xori %10, %13 : vector<32x1xi1>
    %15 = arith.andi %14, %8 : vector<32x1xi1>
    %16 = vector.broadcast %4 : i32 to vector<32x1xi32>
    %17 = arith.addi %6, %16 : vector<32x1xi32>
    %18 = arith.select %15, %17, %6 : vector<32x1xi1>, vector<32x1xi32>
    %c0_i32_4 = arith.constant 0 : i32
    %19 = vector.broadcast %c0_i32_4 : i32 to vector<32x1xi32>
    %20 = arith.cmpi eq, %18, %19 : vector<32x1xi32>
    %c15_i32 = arith.constant 15 : i32
    %21 = vector.broadcast %c15_i32 : i32 to vector<32x1xi32>
    %22 = arith.cmpi eq, %18, %21 : vector<32x1xi32>
    %cst = arith.constant 0.000000e+00 : bf16
    %23 = vector.broadcast %cst : bf16 to vector<1x128xbf16>
    %24 = vector.extract_strided_slice %1 {offsets = [0, 0], sizes = [31, 128], strides = [1, 1]} : vector<32x128xbf16> to vector<31x128xbf16>
    %25 = tpu.concatenate %23, %24 in 0 : vector<1x128xbf16>, vector<31x128xbf16> -> vector<32x128xbf16>
    %cst_5 = arith.constant 0.000000e+00 : bf16
    %26 = vector.broadcast %cst_5 : bf16 to vector<32x128xbf16>
    %27 = vector.shape_cast %20 : vector<32x1xi1> to vector<32x1xi1>
    %28 = vector.broadcast %27 : vector<32x1xi1> to vector<32x128xi1>
    %29 = arith.select %28, %26, %25 : vector<32x128xi1>, vector<32x128xbf16>
    %cst_6 = arith.constant 0.000000e+00 : bf16
    %30 = vector.broadcast %cst_6 : bf16 to vector<1x128xbf16>
    %31 = vector.extract_strided_slice %1 {offsets = [1, 0], sizes = [31, 128], strides = [1, 1]} : vector<32x128xbf16> to vector<31x128xbf16>
    %32 = tpu.concatenate %31, %30 in 0 : vector<31x128xbf16>, vector<1x128xbf16> -> vector<32x128xbf16>
    %cst_7 = arith.constant 0.000000e+00 : bf16
    %33 = vector.broadcast %cst_7 : bf16 to vector<32x128xbf16>
    %34 = vector.shape_cast %22 : vector<32x1xi1> to vector<32x1xi1>
    %35 = vector.broadcast %34 : vector<32x1xi1> to vector<32x128xi1>
    %36 = arith.select %35, %33, %32 : vector<32x128xi1>, vector<32x128xbf16>
    %37 = tpu.concatenate %29, %1, %36 in 1 : vector<32x128xbf16>, vector<32x128xbf16>, vector<32x128xbf16> -> vector<32x384xbf16>
    %c0_8 = arith.constant 0 : index
    %c0_9 = arith.constant 0 : index
    %38 = vector.load %arg2[%c0_8, %c0_9] : memref<384x256xbf16, #tpu.memory_space<vmem>>, vector<384x256xbf16>
    %cst_10 = arith.constant dense<0.000000e+00> : vector<32x256xf32>
    %39 = tpu.matmul %37, %38, %cst_10 {dimension_numbers = #tpu.dot_dimension_numbers<[1], [0], [0], [1], [0, 0, 1, 1], [], []>} : vector<32x384xbf16>, vector<384x256xbf16>, vector<32x256xf32> -> vector<32x256xf32>
    %c0_11 = arith.constant 0 : index
    %c0_12 = arith.constant 0 : index
    %40 = vector.load %arg3[%c0_11, %c0_12] : memref<1x256xf32, #tpu.memory_space<vmem>>, vector<1x256xf32>
    %41 = vector.broadcast %40 : vector<1x256xf32> to vector<32x256xf32>
    %42 = arith.addf %39, %41 : vector<32x256xf32>
    %cst_13 = arith.constant 0.000000e+00 : f32
    %43 = vector.broadcast %cst_13 : f32 to vector<32x256xf32>
    %44 = arith.maximumf %42, %43 : vector<32x256xf32>
    %45 = arith.truncf %44 : vector<32x256xf32> to vector<32x256xbf16>
    %c0_14 = arith.constant 0 : index
    %c0_15 = arith.constant 0 : index
    %46 = vector.load %arg4[%c0_14, %c0_15] : memref<256x384xbf16, #tpu.memory_space<vmem>>, vector<256x384xbf16>
    %cst_16 = arith.constant dense<0.000000e+00> : vector<32x384xf32>
    %47 = tpu.matmul %45, %46, %cst_16 {dimension_numbers = #tpu.dot_dimension_numbers<[1], [0], [0], [1], [0, 0, 1, 1], [], []>} : vector<32x256xbf16>, vector<256x384xbf16>, vector<32x384xf32> -> vector<32x384xf32>
    %48 = vector.extract_strided_slice %47 {offsets = [0, 0], sizes = [32, 128], strides = [1, 1]} : vector<32x384xf32> to vector<32x128xf32>
    %cst_17 = arith.constant 0.000000e+00 : f32
    %49 = vector.broadcast %cst_17 : f32 to vector<1x128xf32>
    %50 = vector.extract_strided_slice %48 {offsets = [0, 0], sizes = [31, 128], strides = [1, 1]} : vector<32x128xf32> to vector<31x128xf32>
    %51 = tpu.concatenate %49, %50 in 0 : vector<1x128xf32>, vector<31x128xf32> -> vector<32x128xf32>
    %cst_18 = arith.constant 0.000000e+00 : f32
    %52 = vector.broadcast %cst_18 : f32 to vector<32x128xf32>
    %53 = vector.shape_cast %20 : vector<32x1xi1> to vector<32x1xi1>
    %54 = vector.broadcast %53 : vector<32x1xi1> to vector<32x128xi1>
    %55 = arith.select %54, %52, %51 : vector<32x128xi1>, vector<32x128xf32>
    %56 = vector.extract_strided_slice %47 {offsets = [0, 128], sizes = [32, 128], strides = [1, 1]} : vector<32x384xf32> to vector<32x128xf32>
    %57 = arith.addf %55, %56 : vector<32x128xf32>
    %58 = vector.extract_strided_slice %47 {offsets = [0, 256], sizes = [32, 128], strides = [1, 1]} : vector<32x384xf32> to vector<32x128xf32>
    %cst_19 = arith.constant 0.000000e+00 : f32
    %59 = vector.broadcast %cst_19 : f32 to vector<1x128xf32>
    %60 = vector.extract_strided_slice %58 {offsets = [1, 0], sizes = [31, 128], strides = [1, 1]} : vector<32x128xf32> to vector<31x128xf32>
    %61 = tpu.concatenate %60, %59 in 0 : vector<31x128xf32>, vector<1x128xf32> -> vector<32x128xf32>
    %cst_20 = arith.constant 0.000000e+00 : f32
    %62 = vector.broadcast %cst_20 : f32 to vector<32x128xf32>
    %63 = vector.shape_cast %22 : vector<32x1xi1> to vector<32x1xi1>
    %64 = vector.broadcast %63 : vector<32x1xi1> to vector<32x128xi1>
    %65 = arith.select %64, %62, %61 : vector<32x128xi1>, vector<32x128xf32>
    %66 = arith.addf %57, %65 : vector<32x128xf32>
    %c0_21 = arith.constant 0 : index
    %c0_22 = arith.constant 0 : index
    %67 = vector.load %arg5[%c0_21, %c0_22] : memref<1x128xf32, #tpu.memory_space<vmem>>, vector<1x128xf32>
    %68 = vector.broadcast %67 : vector<1x128xf32> to vector<32x128xf32>
    %69 = arith.addf %66, %68 : vector<32x128xf32>
    %cst_23 = arith.constant 0.000000e+00 : f32
    %70 = vector.broadcast %cst_23 : f32 to vector<32x128xf32>
    %71 = arith.maximumf %69, %70 : vector<32x128xf32>
    %72 = vector.shape_cast %71 : vector<32x128xf32> to vector<2x16x128xf32>
    %cst_24 = arith.constant dense<0.000000e+00> : vector<2x128xf32>
    %73 = vector.multi_reduction <add>, %72, %cst_24 [1] : vector<2x16x128xf32> to vector<2x128xf32>
    %cst_25 = arith.constant 1.600000e+01 : f32
    %74 = vector.broadcast %cst_25 : f32 to vector<2x128xf32>
    %75 = arith.divf %73, %74 : vector<2x128xf32>
    %c0_26 = arith.constant 0 : index
    %c0_27 = arith.constant 0 : index
    %76 = vector.load %arg6[%c0_26, %c0_27] : memref<128x128xf32, #tpu.memory_space<vmem>>, vector<128x128xf32>
    %cst_28 = arith.constant dense<0.000000e+00> : vector<2x128xf32>
    %77 = tpu.matmul %75, %76, %cst_28 {dimension_numbers = #tpu.dot_dimension_numbers<[1], [0], [0], [1], [0, 0, 1, 1], [], []>} : vector<2x128xf32>, vector<128x128xf32>, vector<2x128xf32> -> vector<2x128xf32>
    %c0_29 = arith.constant 0 : index
    %c0_30 = arith.constant 0 : index
    %78 = vector.load %arg7[%c0_29, %c0_30] : memref<1x128xf32, #tpu.memory_space<vmem>>, vector<1x128xf32>
    %79 = vector.broadcast %78 : vector<1x128xf32> to vector<2x128xf32>
    %80 = arith.addf %77, %79 : vector<2x128xf32>
    %c0_31 = arith.constant 0 : index
    %c0_32 = arith.constant 0 : index
    %81 = vector.load %arg8[%c0_31, %c0_32] : memref<2x128xf32, #tpu.memory_space<vmem>>, vector<2x128xf32>
    tpu.vector_store %arg8[%c0_31, %c0_32], %80 {strides = array<i32>} : memref<2x128xf32, #tpu.memory_space<vmem>>, vector<2x128xf32>,
    return
  }
  func.func @transform_0(%arg0: i32) -> (i32, i32) {
    %c0_i32 = arith.constant 0 : i32
    %c0_i32_0 = arith.constant 0 : i32
    return %arg0, %c0_i32 : i32, i32
  }
  func.func @transform_1(%arg0: i32) -> (i32, i32) {
    %c0_i32 = arith.constant 0 : i32
    %c0_i32_0 = arith.constant 0 : i32
    %c0_i32_1 = arith.constant 0 : i32
    return %c0_i32, %c0_i32_0 : i32, i32
  }
  func.func @transform_2(%arg0: i32) -> (i32, i32) {
    %c0_i32 = arith.constant 0 : i32
    %c0_i32_0 = arith.constant 0 : i32
    %c0_i32_1 = arith.constant 0 : i32
    return %c0_i32, %c0_i32_0 : i32, i32
  }
  func.func @transform_3(%arg0: i32) -> (i32, i32) {
    %c0_i32 = arith.constant 0 : i32
    %c0_i32_0 = arith.constant 0 : i32
    %c0_i32_1 = arith.constant 0 : i32
    return %c0_i32, %c0_i32_0 : i32, i32
  }
  func.func @transform_4(%arg0: i32) -> (i32, i32) {
    %c0_i32 = arith.constant 0 : i32
    %c0_i32_0 = arith.constant 0 : i32
    %c0_i32_1 = arith.constant 0 : i32
    return %c0_i32, %c0_i32_0 : i32, i32
  }
  func.func @transform_5(%arg0: i32) -> (i32, i32) {
    %c0_i32 = arith.constant 0 : i32
    %c0_i32_0 = arith.constant 0 : i32
    %c0_i32_1 = arith.constant 0 : i32
    return %c0_i32, %c0_i32_0 : i32, i32
  }
  func.func @transform_6(%arg0: i32) -> (i32, i32) {
    %c0_i32 = arith.constant 0 : i32
    %c0_i32_0 = arith.constant 0 : i32
    %c0_i32_1 = arith.constant 0 : i32
    return %c0_i32, %c0_i32_0 : i32, i32
  }
  func.func @transform_7(%arg0: i32) -> (i32, i32) {
    %c0_i32 = arith.constant 0 : i32
    %c0_i32_0 = arith.constant 0 : i32
    return %arg0, %c0_i32 : i32, i32
  }
}

</mosaic_0001>

<bundles_post_ra>
// kernel: tpu_custom_call.1
= control target key start
LH: loop header
LB: loop body
LE: loop exit
PB: predicated region body
PF: predicated region fallthrough
CT: control target
= control target key end

     0   :  { %12 = vsyncpa [#allocation3], 0  ;;  %s2032_s0 = inlined_call_operand.hbm [shape: f32[32,128], index: 0, kind: input, shape index: {}]   ;;  %s2033_s1 = inlined_call_operand.hbm [shape: bf16[384,256], index: 1, kind: input, shape index: {}]   ;;  %s2034_s2 = inlined_call_operand.vmem [shape: f32[1,256], index: 2, kind: input, shape index: {}]   ;;  %s2035_s3 = inlined_call_operand.hbm [shape: bf16[256,384], index: 3, kind: input, shape index: {}]   ;;  %s2036_s4 = inlined_call_operand.vmem [shape: f32[1,128], index: 4, kind: input, shape index: {}]   ;;  %s2037_s5 = inlined_call_operand.hbm [shape: f32[128,128], index: 5, kind: input, shape index: {}]   ;;  %s2038_s6 = inlined_call_operand.vmem [shape: f32[1,128], index: 6, kind: input, shape index: {}]   ;;  %s2039_s7 = inlined_call_operand.hbm [shape: f32[2,128], index: 7, kind: output, shape index: {}]  }
   0x1   :  { %13 = vsyncpa [#allocation6], 0 }
   0x2   :  { %14 = vsyncpa [#allocation9], 0 }
   0x3   :  { %15 = vsyncpa [#allocation4], 0  ;;  %s1775_s24 = smov [#allocation5]   ;;  %s1776_s26 = smov [#allocation2]  }
   0x4   :  { %s33_s25 = sshll.u32 %s1775_s24, 4  ;;  %s21_s27 = sshll.u32 %s1776_s26, 4  ;;  %s34_s25 = int_to_ptr.vmem [resolvable:$true] %s33_s25  ;;  %s1828_s27 = int_to_ptr.vmem [resolvable:$true] %s21_s27 }
   0x5   :  { %s1657_s30 = scalar_lea.hbm %s2033_s1, 6144 }
   0x6   :  { %p1658_p0 = scmp.ne.s32.totalorder %s2033_s1, %s1657_s30  ;;  %p1661_p1 = scmp.lt.u32.totalorder %s1657_s30, %s2033_s1 }
   0x8   :  { %p1663_p2 = pnand %p1661_p1, %p1658_p0 }
   0xa   :  { %1666 = shalt.err (!%p1663_p2)
}
   0xb   :  { %s1667_s12 = scalar_lea.vmem %s34_s25, 6144  ;;  %p1672_p4 = scmp.lt.s32.totalorder %s34_s25, %s34_s25 }
   0xc   :  { %p1668_p3 = scmp.ne.s32.totalorder %s34_s25, %s1667_s12  ;;  %p1673_p5 = scmp.lt.s32.totalorder %s1667_s12, %s1667_s12 }
   0xe   :  { %p1674_p6 = por %p1673_p5, %p1672_p4 }
  0x10   :  { %p1675_p7 = pnand %p1674_p6, %p1668_p3 }
  0x12   :  { %1678 = shalt.err (!%p1675_p7)
}
  0x13   :  { %s1777_s13 = smov 128   ;;  %s1778_s14 = smov 8  }
  0x14   :  { %39 = dma.hbm_to_vmem [thread:$0]  %s2033_s1, 6144, %s34_s25, [#allocation6], %s1777_s13, %s1777_s13, %s1778_s14  }
  0x15   :  { %s1679_s19 = scalar_lea.hbm %s2032_s0, 512 }
  0x16   :  { %p1680_p8 = scmp.ne.s32.totalorder %s2032_s0, %s1679_s19  ;;  %p1683_p9 = scmp.lt.u32.totalorder %s1679_s19, %s2032_s0 }
  0x18   :  { %p1685_p10 = pnand %p1683_p9, %p1680_p8 }
  0x1a   :  { %1688 = shalt.err (!%p1685_p10)
}
  0x1b   :  { %s1689_s24 = scalar_lea.vmem %s1828_s27, 512  ;;  %p1694_p12 = scmp.lt.s32.totalorder %s1828_s27, %s1828_s27 }
  0x1c   :  { %p1690_p11 = scmp.ne.s32.totalorder %s1828_s27, %s1689_s24  ;;  %p1695_p13 = scmp.lt.s32.totalorder %s1689_s24, %s1689_s24 }
  0x1e   :  { %p1696_p0 = por %p1695_p13, %p1694_p12 }
  0x20   :  { %p1697_p1 = pnand %p1696_p0, %p1690_p11 }
  0x22   :  { %1700 = shalt.err (!%p1697_p1)
}
  0x23   :  { %27 = dma.hbm_to_vmem [thread:$0]  %s2032_s0, 512, %s1828_s27, [#allocation3], %s1777_s13, %s1777_s13, %s1778_s14  }
  0x24   :  { %s1779_s26 = smov [#allocation7]   ;;  %s1701_s8 = scalar_lea.hbm %s2035_s3, 6144 }
  0x25   :  { %s47_s28 = sshll.u32 %s1779_s26, 4  ;;  %p1702_p2 = scmp.ne.s32.totalorder %s2035_s3, %s1701_s8  ;;  %s48_s28 = int_to_ptr.vmem [resolvable:$true] %s47_s28 }
  0x26   :  { %p1705_p3 = scmp.lt.u32.totalorder %s1701_s8, %s2035_s3 }
  0x28   :  { %p1707_p4 = pnand %p1705_p3, %p1702_p2 }
  0x2a   :  { %1710 = shalt.err (!%p1707_p4)
}
  0x2b   :  { %s1711_s15 = scalar_lea.vmem %s48_s28, 6144  ;;  %p1716_p6 = scmp.lt.s32.totalorder %s48_s28, %s48_s28 }
  0x2c   :  { %p1712_p5 = scmp.ne.s32.totalorder %s48_s28, %s1711_s15  ;;  %p1717_p7 = scmp.lt.s32.totalorder %s1711_s15, %s1711_s15 }
  0x2e   :  { %p1718_p8 = por %p1717_p7, %p1716_p6 }
  0x30   :  { %p1719_p9 = pnand %p1718_p8, %p1712_p5 }
  0x32   :  { %1722 = shalt.err (!%p1719_p9)
}
  0x33   :  { %s1780_s0 = smov 192   ;;  %s1781_s27 = smov 12  }
  0x34   :  { %53 = dma.hbm_to_vmem [thread:$0]  %s2035_s3, 6144, %s48_s28, [#allocation6], %s1780_s0, %s1780_s0, %s1781_s27  }
  0x35   :  { %s1782_s18 = smov [#allocation8]   ;;  %s1723_s22 = scalar_lea.hbm %s2037_s5, 2048 }
  0x36   :  { %s61_s19 = sshll.u32 %s1782_s18, 4  ;;  %p1724_p10 = scmp.ne.s32.totalorder %s2037_s5, %s1723_s22  ;;  %s62_s19 = int_to_ptr.vmem [resolvable:$true] %s61_s19 }
  0x37   :  { %p1727_p11 = scmp.lt.u32.totalorder %s1723_s22, %s2037_s5 }
  0x39   :  { %p1729_p12 = pnand %p1727_p11, %p1724_p10 }
  0x3b   :  { %1732 = shalt.err (!%p1729_p12)
}
  0x3c   :  { %s1733_s26 = scalar_lea.vmem %s62_s19, 2048  ;;  %p1738_p0 = scmp.lt.s32.totalorder %s62_s19, %s62_s19 }
  0x3d   :  { %p1734_p13 = scmp.ne.s32.totalorder %s62_s19, %s1733_s26  ;;  %p1739_p1 = scmp.lt.s32.totalorder %s1733_s26, %s1733_s26 }
  0x3f   :  { %p1740_p2 = por %p1739_p1, %p1738_p0 }
  0x41   :  { %p1741_p3 = pnand %p1740_p2, %p1734_p13 }
  0x43   :  { %1744 = shalt.err (!%p1741_p3)
}
  0x44   :  { %67 = dma.hbm_to_vmem [thread:$0]  %s2037_s5, 2048, %s62_s19, [#allocation9], %s1777_s13, %s1777_s13, %s1778_s14  }
  0x45   :  { %1767 = dma.done.wait [#allocation3], 512  }
  0x46   :  { %1768 = vsyncadd [#allocation3], 4294966784 }
  0x47   :  { %1769 = dma.done.wait [#allocation6], 12288  }
  0x48   :  { %1770 = vsyncadd [#allocation6], 4294955008 }
  0x49   :  { %1771 = dma.done.wait [#allocation9], 2048  }
  0x4a   :  { %1772 = vsyncadd [#allocation9], 4294965248  ;;  %v1521_v0 = vld [vmem:[#allocation5 + $0x4] ss:$8 sps:$4 sm:$0xff]   ;;  %v1523_v1 = vld [vmem:[#allocation5] ss:$8 sps:$4 sm:$0xff]   ;;  %v91_v20 = vlaneseq }
  0x4b   :  { %536 = vmatprep.subr.bf16.mxu0 %v1521_v0  ;;  %v1524_v2 = vld [vmem:[#allocation5 + $0x14] ss:$8 sps:$4 sm:$0xff]   ;;  %v1526_v3 = vld [vmem:[#allocation5 + $0x10] ss:$8 sps:$4 sm:$0xff]   ;;  %v1527_v4 = vld [vmem:[#allocation5 + $0x24] ss:$8 sps:$4 sm:$0xff]  }
  0x4c   :  { %537 = vmatpush1.bf16.msra.mxu0 %v1523_v1  ;;  %v1529_v5 = vld [vmem:[#allocation5 + $0x20] ss:$8 sps:$4 sm:$0xff]   ;;  %v1530_v6 = vld [vmem:[#allocation5 + $0x34] ss:$8 sps:$4 sm:$0xff]   ;;  %v1532_v7 = vld [vmem:[#allocation5 + $0x30] ss:$8 sps:$4 sm:$0xff]  }
  0x4d   :  { %538 = vmatprep.subr.bf16.mxu0 %v1524_v2  ;;  %v1533_v8 = vld [vmem:[#allocation5 + $0x44] ss:$8 sps:$4 sm:$0xff]   ;;  %v1535_v9 = vld [vmem:[#allocation5 + $0x40] ss:$8 sps:$4 sm:$0xff]   ;;  %v1536_v10 = vld [vmem:[#allocation5 + $0x54] ss:$8 sps:$4 sm:$0xff]  }
  0x4e   :  { %v1538_v11 = vld [vmem:[#allocation5 + $0x50] ss:$8 sps:$4 sm:$0xff]   ;;  %v1539_v12 = vld [vmem:[#allocation5 + $0x64] ss:$8 sps:$4 sm:$0xff]   ;;  %v1541_v16 = vld [vmem:[#allocation5 + $0x60] ss:$8 sps:$4 sm:$0xff]  }
  0x4f   :  { %v85_v13 = vld [vmem:[#allocation2] sm:$0xff]  ;;  %v86_v14 = vld [vmem:[#allocation2 + $0x8] sm:$0xff]  ;;  %v1542_v17 = vld [vmem:[#allocation5 + $0x74] ss:$8 sps:$4 sm:$0xff]   ;;  %v1895_v25 = vshrl.u32 %v91_v20, 7  ;;  %vm1783_vm0 = vmmov 0  }
  0x50   :  { %539 = vmatpush1.bf16.msra.mxu0 %v1526_v3  ;;  %v1892_v15 = vpack.c.bf16 %v86_v14, %v85_v13  ;;  %v1544_v18 = vld [vmem:[#allocation5 + $0x70] ss:$8 sps:$4 sm:$0xff]   ;;  %v1545_v19 = vld [vmem:[#allocation5 + $0x84] ss:$8 sps:$4 sm:$0xff]   ;;  %v1547_v21 = vld [vmem:[#allocation5 + $0x80] ss:$8 sps:$4 sm:$0xff]  }
  0x51   :  { %540 = vmatprep.subr.bf16.mxu0 %v1527_v4  ;;  %v1548_v22 = vld [vmem:[#allocation5 + $0x94] ss:$8 sps:$4 sm:$0xff]   ;;  %v1550_v23 = vld [vmem:[#allocation5 + $0x90] ss:$8 sps:$4 sm:$0xff]   ;;  %v1551_v24 = vld [vmem:[#allocation5 + $0xa4] ss:$8 sps:$4 sm:$0xff]  }
  0x52   :  { %568 = vmatprep.mubr.bf16.mxu0 %v1892_v15  ;;  %v1593_v26 = vld [vmem:[#allocation7 + $0x4] ss:$12 sps:$4 sm:$0xff]   ;;  %v1595_v27 = vld [vmem:[#allocation7] ss:$12 sps:$4 sm:$0xff]   ;;  %v1596_v28 = vld [vmem:[#allocation7 + $0x1c] ss:$12 sps:$4 sm:$0xff]  }
  0x53   :  { %974 = vmatprep.subr.bf16.mxu1 %v1593_v26  ;;  %v100_v29 = vand.u32 15, %v1895_v25  ;;  %vm1900_vm1 = vmpackc.low %vm1783_vm0, %vm1783_vm0  ;;  %v1598_v31 = vld [vmem:[#allocation7 + $0x18] ss:$12 sps:$4 sm:$0xff]   ;;  %v1553_v32 = vld [vmem:[#allocation5 + $0xa0] ss:$8 sps:$4 sm:$0xff]   ;;  %v94_v33 = vadd.s32 16, %v1895_v25 }
  0x54   :  { %541 = vmatpush1.bf16.msra.mxu0 %v1529_v5  ;;  %975 = vmatpush1.bf16.msra.mxu1 %v1595_v27  ;;  %v1599_v34 = vld [vmem:[#allocation7 + $0x34] ss:$12 sps:$4 sm:$0xff]   ;;  %v1556_v36 = vld [vmem:[#allocation5 + $0xb0] ss:$8 sps:$4 sm:$0xff]   ;;  %v154_v37 = vshrl.u32 %v1892_v15, 16  ;;  %v157_v46 = vshll.u32 %v1892_v15, 16 }
  0x55   :  { %542 = vmatprep.subr.bf16.mxu0 %v1530_v6  ;;  %976 = vmatprep.subr.bf16.mxu1 %v1596_v28  ;;  %v1554_v35 = vld [vmem:[#allocation5 + $0xb4] ss:$8 sps:$4 sm:$0xff]   ;;  %vm1906_vm2 = vcmp.eq.s32.totalorder %v100_v29, 0  ;;  %v114_v42 = vand.u32 15, %v94_v33  ;;  %v1602_v43 = vld [vmem:[#allocation7 + $0x4c] ss:$12 sps:$4 sm:$0xff]  }
  0x56   :  { %v87_v39 = vld [vmem:[#allocation2 + $0x10] sm:$0xff]  ;;  %v88_v41 = vld [vmem:[#allocation2 + $0x18] sm:$0xff]  ;;  %v1557_v44 = vld [vmem:[#allocation5 + $0xc4] ss:$8 sps:$4 sm:$0xff]   ;;  %vm152_vm3 = vsmask.f32 256 }
  0x57   :  { %v1601_v40 = vld [vmem:[#allocation7 + $0x30] ss:$12 sps:$4 sm:$0xff]   ;;  %vm181_vm4 = vmpackc.low %vm1906_vm2, %vm1906_vm2  ;;  %v1915_v45 = vrot.slane %v154_v37, 7  ;;  %vm170_vm5 = vcmask 1040384   ;;  %v1918_v47 = vpack.c.bf16 %v88_v41, %v87_v39  ;;  %v1604_v48 = vld [vmem:[#allocation7 + $0x48] ss:$12 sps:$4 sm:$0xff]  }
  0x58   :  { %543 = vmatpush1.bf16.msra.mxu0 %v1532_v7  ;;  %977 = vmatpush1.bf16.msra.mxu1 %v1598_v31  ;;  %v1559_v49 = vld [vmem:[#allocation5 + $0xc0] ss:$8 sps:$4 sm:$0xff]   ;;  %vm1920_vm6 = vcmp.eq.s32.totalorder %v114_v42, 0  ;;  %v1605_v51 = vld [vmem:[#allocation7 + $0x64] ss:$12 sps:$4 sm:$0xff]   ;;  %v1784_v53 = vmov 0   ;;  %vm1932_vm7 = vmand %vm170_vm5, %vm152_vm3 }
  0x59   :  { %544 = vmatprep.subr.bf16.mxu0 %v1533_v8  ;;  %978 = vmatprep.subr.bf16.mxu1 %v1599_v34  ;;  %v1560_v52 = vld [vmem:[#allocation5 + $0xd4] ss:$8 sps:$4 sm:$0xff]   ;;  %v185_v54 = vsel %vm181_vm4, 65537, %v1784_v53  ;;  %v1928_v55 = vsel %vm1900_vm1, 65537, %v1784_v53  ;;  %v159_v57 = vor.u32 %v157_v46, %v1915_v45  ;;  %v161_v58 = vshrl.u32 %v1918_v47, 16  ;;  %vm183_vm8 = vmpackc.low %vm1920_vm6, %vm1920_vm6  ;;  %s1787_s30 = smov [#allocation10]  }
  0x5a   :  { %v1607_v59 = vld [vmem:[#allocation7 + $0x60] ss:$12 sps:$4 sm:$0xff]   ;;  %v1562_v60 = vld [vmem:[#allocation5 + $0xd0] ss:$8 sps:$4 sm:$0xff]   ;;  %v1274_v61 = vcombine.low %v185_v54, %v1928_v55  ;;  %v1608_v62 = vld [vmem:[#allocation7 + $0x7c] ss:$12 sps:$4 sm:$0xff]  }
  0x5b   :  { %v1563_v63 = vld [vmem:[#allocation5 + $0xe4] ss:$8 sps:$4 sm:$0xff]   ;;  %v1565_v0 = vld [vmem:[#allocation5 + $0xe0] ss:$8 sps:$4 sm:$0xff]   ;;  %v187_v1 = vsel %vm183_vm8, 65537, %v1784_v53  ;;  %v172_v5 = vsel %vm1932_vm7, 0, %v159_v57 }
  0x5c   :  { %545 = vmatpush1.bf16.msra.mxu0 %v1535_v9  ;;  %979 = vmatpush1.bf16.msra.mxu1 %v1601_v40  ;;  %v1610_v2 = vld [vmem:[#allocation7 + $0x78] ss:$12 sps:$4 sm:$0xff]   ;;  %v1611_v3 = vld [vmem:[#allocation7 + $0x94] ss:$12 sps:$4 sm:$0xff]   ;;  %v164_v6 = vshll.u32 %v1918_v47, 16  ;;  %v163_v7 = vrot.slane %v161_v58, 7 }
  0x5d   :  { %546 = vmatprep.subr.bf16.mxu0 %v1536_v10  ;;  %980 = vmatprep.subr.bf16.mxu1 %v1602_v43  ;;  %v1566_v4 = vld [vmem:[#allocation5 + $0xf4] ss:$8 sps:$4 sm:$0xff]   ;;  %vm1950_vm9 = vcmp.eq.s16.totalorder %v1274_v61, 0  ;;  %v1568_v10 = vld [vmem:[#allocation5 + $0xf0] ss:$8 sps:$4 sm:$0xff]   ;;  %v93_v30 = vadd.s32 8, %v1895_v25 }
  0x5e   :  { %v1613_v9 = vld [vmem:[#allocation7 + $0x90] ss:$12 sps:$4 sm:$0xff]   ;;  %v1616_v13 = vld [vmem:[#allocation7 + $0xa8] ss:$12 sps:$4 sm:$0xff]   ;;  %v166_v20 = vor.u32 %v164_v6, %v163_v7  ;;  %v1626_v33 = vld [vmem:[#allocation7 + $0x10c] ss:$12 sps:$4 sm:$0xff]  }
  0x5f   :  { %v1569_v14 = vld [vmem:[#allocation5 + $0x100] ss:$8 sps:$4 sm:$0xff]   ;;  %v1580_v28 = vld [vmem:[#allocation5 + $0x134] ss:$8 sps:$4 sm:$0xff]   ;;  %v1583_v34 = vld [vmem:[#allocation5 + $0x144] ss:$8 sps:$4 sm:$0xff]  }
  0x60   :  { %547 = vmatpush1.bf16.msra.mxu0 %v1538_v11  ;;  %981 = vmatpush1.bf16.msra.mxu1 %v1604_v48  ;;  %v1614_v11 = vld [vmem:[#allocation7 + $0xac] ss:$12 sps:$4 sm:$0xff]   ;;  %v1575_v26 = vld [vmem:[#allocation5 + $0x120] ss:$8 sps:$4 sm:$0xff]   ;;  %v167_v27 = vsel %vm152_vm3, %v1915_v45, %v166_v20  ;;  %v1625_v31 = vld [vmem:[#allocation7 + $0xf0] ss:$12 sps:$4 sm:$0xff]  }
  0x61   :  { %548 = vmatprep.subr.bf16.mxu0 %v1539_v12  ;;  %982 = vmatprep.subr.bf16.mxu1 %v1605_v51  ;;  %v1571_v12 = vld [vmem:[#allocation5 + $0x104] ss:$8 sps:$4 sm:$0xff]   ;;  %v1623_v29 = vld [vmem:[#allocation7 + $0xf4] ss:$12 sps:$4 sm:$0xff]   ;;  %v95_v43 = vadd.s32 24, %v1895_v25  ;;  %v200_v54 = vrot.slane %v157_v46, 1 }
  0x62   :  { %v1581_v39 = vld [vmem:[#allocation5 + $0x140] ss:$8 sps:$4 sm:$0xff]   ;;  %v1629_v40 = vld [vmem:[#allocation7 + $0x124] ss:$12 sps:$4 sm:$0xff]   ;;  %v1586_v41 = vld [vmem:[#allocation5 + $0x154] ss:$8 sps:$4 sm:$0xff]  }
  0x63   :  { %v1584_v45 = vld [vmem:[#allocation5 + $0x150] ss:$8 sps:$4 sm:$0xff]   ;;  %v1632_v48 = vld [vmem:[#allocation7 + $0x13c] ss:$12 sps:$4 sm:$0xff]   ;;  %v121_v51 = vand.u32 15, %v95_v43  ;;  %v201_v61 = vor.u32 %v200_v54, %v154_v37  ;;  %vm207_vm3 = vcmask 1047552  }
  0x64   :  { %549 = vmatpush1.bf16.msra.mxu0 %v1541_v16  ;;  %983 = vmatpush1.bf16.msra.mxu1 %v1607_v59  ;;  %v1574_v16 = vld [vmem:[#allocation5 + $0x114] ss:$8 sps:$4 sm:$0xff]   ;;  %v1587_v56 = vld [vmem:[#allocation5 + $0x160] ss:$8 sps:$4 sm:$0xff]   ;;  %v1590_v46 = vld [vmem:[#allocation5 + $0x170] ss:$8 sps:$4 sm:$0xff]  }
  0x65   :  { %550 = vmatprep.subr.bf16.mxu0 %v1542_v17  ;;  %984 = vmatprep.subr.bf16.mxu1 %v1608_v62  ;;  %v1617_v17 = vld [vmem:[#allocation7 + $0xc4] ss:$12 sps:$4 sm:$0xff]   ;;  %v1592_v57 = vld [vmem:[#allocation5 + $0x174] ss:$8 sps:$4 sm:$0xff]   ;;  %vm1975_vm13 = vcmp.eq.s32.totalorder %v121_v51, 15  ;;  %v202_v62 = vrot.slane %v164_v6, 1 }
  0x66   :  { %vm199_vm14 = vsmask.f32 7424  ;;  %vm221_vm15 = vmpackc.low %vm1975_vm13, %vm1975_vm13  ;;  %v1640_v6 = vld [vmem:[#allocation7 + $0x168] ss:$12 sps:$4 sm:$0xff]   ;;  %v1651_v54 = vld [vmem:[#allocation7 + $0x140] ss:$12 sps:$4 sm:$0xff]  }
  0x67   :  { %v204_v15 = vor.u32 %v202_v62, %v161_v58  ;;  %vm208_vm4 = vmand %vm207_vm3, %vm199_vm14  ;;  %v1641_v7 = vld [vmem:[#allocation7 + $0xc8] ss:$12 sps:$4 sm:$0xff]   ;;  %s1263_s8 = sshll.u32 %s1787_s30, 4  ;;  %s1264_s8 = int_to_ptr.vmem [resolvable:$true] %s1263_s8 }
  0x68   :  { %551 = vmatpush1.bf16.msra.mxu0 %v1544_v18  ;;  %985 = vmatpush1.bf16.msra.mxu1 %v1610_v2  ;;  %v1619_v18 = vld [vmem:[#allocation7 + $0xc0] ss:$12 sps:$4 sm:$0xff]   ;;  %v1649_v51 = vld [vmem:[#allocation7 + $0x128] ss:$12 sps:$4 sm:$0xff]   ;;  %s1745_s9 = scalar_lea.vmem %s1264_s8, 32  ;;  %p1750_p5 = scmp.lt.s32.totalorder %s1264_s8, %s1264_s8 }
  0x69   :  { %552 = vmatprep.subr.bf16.mxu0 %v1545_v19  ;;  %986 = vmatprep.subr.bf16.mxu1 %v1611_v3  ;;  %v1572_v19 = vld [vmem:[#allocation5 + $0x110] ss:$8 sps:$4 sm:$0xff]   ;;  %v209_v2 = vsel %vm208_vm4, %v204_v15, 0  ;;  %v1635_v3 = vld [vmem:[#allocation7 + $0x154] ss:$12 sps:$4 sm:$0xff]   ;;  %p1746_p4 = scmp.ne.s32.totalorder %s1264_s8, %s1745_s9  ;;  %p1751_p6 = scmp.lt.s32.totalorder %s1745_s9, %s1745_s9 }
  0x6a   :  { %v1160_v15 = vld [vmem:[#allocation8 + $0x10] sm:$0xff] }
  0x6b   :  { %p1752_p7 = por %p1751_p6, %p1750_p5 }
  0x6c   :  { %553 = vmatpush1.bf16.msra.mxu0 %v1547_v21  ;;  %987 = vmatpush1.bf16.msra.mxu1 %v1613_v9  ;;  %v1275_v21 = vcombine.low %v187_v1, %v1928_v55  ;;  %v225_v1 = vsel %vm221_vm15, 65537, %v1784_v53 }
  0x6d   :  { %554 = vmatprep.subr.bf16.mxu0 %v1548_v22  ;;  %988 = vmatprep.subr.bf16.mxu1 %v1614_v11  ;;  %v1620_v22 = vld [vmem:[#allocation7 + $0xdc] ss:$12 sps:$4 sm:$0xff]   ;;  %v1277_v37 = vcombine.low %v1928_v55, %v225_v1  ;;  %v1785_v1 = vmov 0.0|0.0   ;;  %p1753_p8 = pnand %p1752_p7, %p1746_p4 }
  0x6e   :  { %vm1385_vm10 = vcmp.eq.s16.totalorder %v1275_v21, 0 }
  0x6f   :  { %vm1387_vm7 = vcmp.eq.s16.totalorder %v1277_v37, 0  ;;  %v1161_v37 = vld [vmem:[#allocation8 + $0x18] sm:$0xff] }
  0x70   :  { %555 = vmatpush1.bf16.msra.mxu0 %v1550_v23  ;;  %989 = vmatpush1.bf16.msra.mxu1 %v1616_v13  ;;  %v1577_v23 = vld [vmem:[#allocation5 + $0x124] ss:$8 sps:$4 sm:$0xff]  }
  0x71   :  { %556 = vmatprep.subr.bf16.mxu0 %v1551_v24  ;;  %990 = vmatprep.subr.bf16.mxu1 %v1617_v17  ;;  %v1622_v24 = vld [vmem:[#allocation7 + $0xd8] ss:$12 sps:$4 sm:$0xff]  }
  0x74   :  { %557 = vmatpush1.bf16.msra.mxu0 %v1553_v32  ;;  %991 = vmatpush1.bf16.msra.mxu1 %v1619_v18  ;;  %v1578_v32 = vld [vmem:[#allocation5 + $0x130] ss:$8 sps:$4 sm:$0xff]  }
  0x75   :  { %558 = vmatprep.subr.bf16.mxu0 %v1554_v35  ;;  %992 = vmatprep.subr.bf16.mxu1 %v1620_v22  ;;  %v107_v35 = vand.u32 15, %v93_v30 }
  0x77   :  { %vm1964_vm11 = vcmp.eq.s32.totalorder %v107_v35, 15 }
  0x78   :  { %559 = vmatpush1.bf16.msra.mxu0 %v1556_v36  ;;  %993 = vmatpush1.bf16.msra.mxu1 %v1622_v24  ;;  %v1628_v36 = vld [vmem:[#allocation7 + $0x108] ss:$12 sps:$4 sm:$0xff]   ;;  %vm219_vm12 = vmpackc.low %vm1964_vm11, %vm1964_vm11 }
  0x79   :  { %560 = vmatprep.subr.bf16.mxu0 %v1557_v44  ;;  %994 = vmatprep.subr.bf16.mxu1 %v1623_v29  ;;  %v1631_v44 = vld [vmem:[#allocation7 + $0x120] ss:$12 sps:$4 sm:$0xff]   ;;  %v223_v59 = vsel %vm219_vm12, 65537, %v1784_v53 }
  0x7c   :  { %561 = vmatpush1.bf16.msra.mxu0 %v1559_v49  ;;  %995 = vmatpush1.bf16.msra.mxu1 %v1625_v31  ;;  %v1589_v49 = vld [vmem:[#allocation5 + $0x164] ss:$8 sps:$4 sm:$0xff]  }
  0x7d   :  { %562 = vmatprep.subr.bf16.mxu0 %v1560_v52  ;;  %996 = vmatprep.subr.bf16.mxu1 %v1626_v33  ;;  %v1634_v52 = vld [vmem:[#allocation7 + $0x138] ss:$12 sps:$4 sm:$0xff]  }
  0x80   :  { %563 = vmatpush1.bf16.msra.mxu0 %v1562_v60  ;;  %997 = vmatpush1.bf16.msra.mxu1 %v1628_v36 }
  0x81   :  { %564 = vmatprep.subr.bf16.mxu0 %v1563_v63  ;;  %998 = vmatprep.subr.bf16.mxu1 %v1629_v40  ;;  %v1276_v63 = vcombine.low %v1928_v55, %v223_v59  ;;  %v292_v55 = vsub.s32 1, %v1895_v25  ;;  %v1654_v59 = vld [vmem:[#allocation7 + $0x98] ss:$12 sps:$4 sm:$0xff]  }
  0x83   :  { %vm1386_vm1 = vcmp.eq.s16.totalorder %v1276_v63, 0  ;;  %v1159_v63 = vld [vmem:[#allocation8 + $0x8] sm:$0xff] }
  0x84   :  { %565 = vmatpush1.bf16.msra.mxu0 %v1565_v0  ;;  %999 = vmatpush1.bf16.msra.mxu1 %v1631_v44  ;;  %v203_v0 = vsel %vm199_vm14, %v201_v61, %v202_v62  ;;  %v1655_v61 = vld [vmem:[#allocation7 + $0x170] ss:$12 sps:$4 sm:$0xff]  }
  0x85   :  { %566 = vmatprep.subr.bf16.mxu0 %v1566_v4  ;;  %1000 = vmatprep.subr.bf16.mxu1 %v1632_v48  ;;  %v1637_v4 = vld [vmem:[#allocation7 + $0x150] ss:$12 sps:$4 sm:$0xff]  }
  0x86   :  { %v1647_v48 = vld [vmem:[#allocation7 + $0x110] ss:$12 sps:$4 sm:$0xff]  }
  0x87   :  { %v1656_v62 = vld [vmem:[#allocation7 + $0xb0] ss:$12 sps:$4 sm:$0xff]  }
  0x88   :  { %567 = vmatpush1.bf16.msra.mxu0 %v1568_v10  ;;  %1001 = vmatpush1.bf16.msra.mxu1 %v1634_v52  ;;  %v1650_v52 = vld [vmem:[#allocation7 + $0x68] ss:$12 sps:$4 sm:$0xff]  }
  0x89   :  { %589 = vmatprep.subr.bf16.mxu0 %v1571_v12  ;;  %1002 = vmatprep.subr.bf16.mxu1 %v1635_v3  ;;  %v1162_v3 = vld [vmem:[#allocation8 + $0x20] sm:$0xff] }
  0x8b   :  { %1327 = vmatmul.mubr.msk.bf16.vlgmr.msra.gmra.mrb[0].mxu0 %vm1950_vm9, %v172_v5  ;;  %v1638_v5 = vld [vmem:[#allocation7 + $0x16c] ss:$12 sps:$4 sm:$0xff]  }
  0x8c   :  { %590 = vmatpush1.bf16.msra.mxu0 %v1569_v14  ;;  %578 = vmatprep.mubr.bf16.mxu0 %v1918_v47  ;;  %v284_v47 = vld [vmem:[%s2034_s2] sm:$0x3] }
  0x8d   :  { %591 = vmatprep.subr.bf16.mxu0 %v1574_v16  ;;  %1003 = vmatpush1.bf16.msra.mxu1 %v1637_v4  ;;  %v293_v8 = vrot.slane %v284_v47, %v292_v55  ;;  %v1163_v4 = vld [vmem:[#allocation8 + $0x28] sm:$0xff] }
  0x8e   :  { %1004 = vmatprep.subr.bf16.mxu1 %v1638_v5  ;;  %v1475_v5 = vpack.c.bf16 %v1163_v4, %v1162_v3  ;;  %v1167_v55 = vld [vmem:[#allocation8 + $0x48] sm:$0xff] }
  0x90   :  { %592 = vmatpush1.bf16.msra.mxu0 %v1572_v19 }
  0x91   :  { %593 = vmatprep.subr.bf16.mxu0 %v1577_v23  ;;  %1005 = vmatpush1.bf16.msra.mxu1 %v1640_v6  ;;  %v1164_v6 = vld [vmem:[#allocation8 + $0x30] sm:$0xff] }
  0x92   :  { %1388 = vmatprep.subr.bf16.mxu1 %v1641_v7  ;;  %v1165_v7 = vld [vmem:[#allocation8 + $0x38] sm:$0xff] }
  0x93   :  { %1329 = vmatmul.mubr.msk.bf16.gmra.mrb[4].mxu0 %vm1385_vm10, %v167_v27 }
  0x94   :  { %594 = vmatpush1.bf16.msra.mxu0 %v1575_v26  ;;  %621 = vmatprep.mubr.bf16.mxu0 %v1784_v53  ;;  %v1642_v26 = vld [vmem:[#allocation7 + $0x8] ss:$12 sps:$4 sm:$0xff]  }
  0x95   :  { %595 = vmatprep.subr.bf16.mxu0 %v1580_v28  ;;  %v1643_v28 = vld [vmem:[#allocation7 + $0xe0] ss:$12 sps:$4 sm:$0xff]  }
  0x98   :  { %596 = vmatpush1.bf16.msra.mxu0 %v1578_v32 }
  0x99   :  { %597 = vmatprep.subr.bf16.mxu0 %v1583_v34  ;;  %v1644_v34 = vld [vmem:[#allocation7 + $0x20] ss:$12 sps:$4 sm:$0xff]  }
  0x9c   :  { %598 = vmatpush1.bf16.msra.mxu0 %v1581_v39  ;;  %v1645_v39 = vld [vmem:[#allocation7 + $0xf8] ss:$12 sps:$4 sm:$0xff]  }
  0x9d   :  { %599 = vmatprep.subr.bf16.mxu0 %v1586_v41 }
  0xa0   :  { %600 = vmatpush1.bf16.msra.mxu0 %v1584_v45  ;;  %v1646_v45 = vld [vmem:[#allocation7 + $0x38] ss:$12 sps:$4 sm:$0xff]  }
  0xa1   :  { %601 = vmatprep.subr.bf16.mxu0 %v1589_v49  ;;  %v1648_v49 = vld [vmem:[#allocation7 + $0x50] ss:$12 sps:$4 sm:$0xff]  }
  0xa4   :  { %602 = vmatpush1.bf16.msra.mxu0 %v1587_v56  ;;  %v1652_v56 = vld [vmem:[#allocation7 + $0x80] ss:$12 sps:$4 sm:$0xff]  }
  0xa5   :  { %603 = vmatprep.subr.bf16.mxu0 %v1592_v57  ;;  %v1653_v57 = vld [vmem:[#allocation7 + $0x158] ss:$12 sps:$4 sm:$0xff]  }
  0xa8   :  { %604 = vmatpush1.bf16.msra.mxu0 %v1590_v46  ;;  %v1158_v46 = vld [vmem:[#allocation8] sm:$0xff] }
  0xa9   :  { %1468 = vmatprep.subr.bf16.mxu0 %v1785_v1 }
  0xab   :  { %1331 = vmatmul.mubr.msk.bf16.vlgmr.msra.gmra.mrb[0].mxu0 %vm1386_vm1, %v203_v0  ;;  %v1469_v0 = vpack.c.bf16 %v1159_v63, %v1158_v46 }
  0xac   :  { %631 = vmatprep.mubr.bf16.mxu0 %v1784_v53  ;;  %v288_v53 = vsub.s32 0, %v1895_v25 }
  0xad   :  { %1470 = vmatpush3.bf16.msra.mxu0 %v1469_v0 }
  0xae   :  { %v289_v58 = vrot.slane %v284_v47, %v288_v53  ;;  %1471 = vmatprep.subr.bf16.mxu0 %v1785_v1  ;;  %v1478_v53 = vpack.c.bf16 %v1165_v7, %v1164_v6  ;;  %v1166_v47 = vld [vmem:[#allocation8 + $0x40] sm:$0xff] }
  0xb3   :  { %1333 = vmatmul.mubr.msk.bf16.gmra.mrb[4].mxu0 %vm1387_vm7, %v209_v2  ;;  %v1472_v2 = vpack.c.bf16 %v1161_v37, %v1160_v15 }
  0xb5   :  { %1473 = vmatpush3.bf16.msra.mxu0 %v1472_v2 }
  0xb6   :  { %1474 = vmatprep.subr.bf16.mxu0 %v1785_v1 }
  0xb9   :  { %1476 = vmatpush3.bf16.msra.mxu0 %v1475_v5 }
  0xba   :  { %1477 = vmatprep.subr.bf16.mxu0 %v1785_v1 }
  0xbd   :  { %1479 = vmatpush3.bf16.msra.mxu0 %v1478_v53 }
  0xbe   :  { %1480 = vmatprep.subr.bf16.mxu0 %v1785_v1 }
 0x17e   :  { %v623_v9 = vpop.f32.mrb[0].mxu0 }
 0x17f   :  { %v1492_v10 = vadd.f32 %v623_v9, %v289_v58  ;;  %v625_v11 = vpop.f32.mrb[1].mxu0  ;;  %v1169_v9 = vld [vmem:[#allocation8 + $0x58] sm:$0xff] }
 0x180   :  { %v1493_v12 = vadd.f32 %v625_v11, %v293_v8  ;;  %v627_v13 = vpop.f32.mrb[2].mxu0  ;;  %v1170_v11 = vld [vmem:[#allocation8 + $0x60] sm:$0xff] }
 0x181   :  { %v1494_v14 = vadd.f32 %v627_v13, %v289_v58  ;;  %v629_v16 = vpop.f32.mrb[3].mxu0  ;;  %v642_v18 = vmax.f32 %v1492_v10, 0.0 }
 0x182   :  { %v1495_v17 = vadd.f32 %v629_v16, %v293_v8  ;;  %v643_v20 = vmax.f32 %v1493_v12, 0.0  ;;  %v1171_v12 = vld [vmem:[#allocation8 + $0x68] sm:$0xff]  ;;  %v1173_v16 = vld [vmem:[#allocation8 + $0x78] sm:$0xff] }
 0x183   :  { %v644_v19 = vmax.f32 %v1494_v14, 0.0  ;;  %v1487_v13 = vpack.c.bf16 %v1171_v12, %v1170_v11  ;;  %v1172_v14 = vld [vmem:[#allocation8 + $0x70] sm:$0xff] }
 0x184   :  { %v645_v21 = vmax.f32 %v1495_v17, 0.0  ;;  %v1786_v17 = vmov 0.0  }
 0x185   :  { %v650_v22 = vpack.c.bf16 %v644_v19, %v642_v18  ;;  %1465 = vmatprep.mubr.msk.f32.mxu0 %vm1783_vm0, %v1786_v17  ;;  %v1490_v18 = vpack.c.bf16 %v1173_v16, %v1172_v14  ;;  %vm1105_vm0 = vcmask 1046528  }
 0x186   :  { %v633_v23 = vpop.f32.mrb[4].mxu0  ;;  %v651_v24 = vpack.c.bf16 %v645_v21, %v643_v20 }
 0x187   :  { %v1496_v27 = vadd.f32 %v633_v23, %v289_v58  ;;  %v635_v25 = vpop.f32.mrb[5].mxu0 }
 0x188   :  { %v1497_v29 = vadd.f32 %v635_v25, %v293_v8  ;;  %v637_v30 = vpop.f32.mrb[6].mxu0  ;;  %1006 = vmatprep.mubr.bf16.mxu1 %v651_v24 }
 0x189   :  { %v1498_v31 = vadd.f32 %v637_v30, %v289_v58  ;;  %v639_v32 = vpop.f32.mrb[7].mxu0  ;;  %1007 = vmatmul.mubr.bf16.vlgmr.msra.gmra.mrb[0].mxu1 %v650_v22  ;;  %v646_v35 = vmax.f32 %v1496_v27, 0.0  ;;  %v1481_v58 = vpack.c.bf16 %v1167_v55, %v1166_v47 }
 0x18a   :  { %v1499_v33 = vadd.f32 %v639_v32, %v293_v8  ;;  %1389 = vmatpush3.bf16.msra.mxu1 %v1642_v26  ;;  %v647_v40 = vmax.f32 %v1497_v29, 0.0  ;;  %v1168_v8 = vld [vmem:[#allocation8 + $0x50] sm:$0xff] }
 0x18b   :  { %v648_v36 = vmax.f32 %v1498_v31, 0.0  ;;  %1390 = vmatprep.subr.bf16.mxu1 %v1643_v28  ;;  %1482 = vmatpush3.bf16.msra.mxu0 %v1481_v58  ;;  %v1484_v10 = vpack.c.bf16 %v1169_v9, %v1168_v8 }
 0x18c   :  { %v649_v41 = vmax.f32 %v1499_v33, 0.0  ;;  %1483 = vmatprep.subr.bf16.mxu0 %v1785_v1 }
 0x18d   :  { %v652_v43 = vpack.c.bf16 %v648_v36, %v646_v35 }
 0x18e   :  { %v653_v44 = vpack.c.bf16 %v649_v41, %v647_v40  ;;  %1391 = vmatpush3.bf16.msra.mxu1 %v1644_v34 }
 0x18f   :  { %1392 = vmatprep.subr.bf16.mxu1 %v1645_v39  ;;  %1485 = vmatpush3.bf16.msra.mxu0 %v1484_v10 }
 0x190   :  { %1016 = vmatprep.mubr.bf16.mxu1 %v653_v44  ;;  %1486 = vmatprep.subr.bf16.mxu0 %v1785_v1 }
 0x191   :  { %1017 = vmatmul.mubr.bf16.gmra.mrb[4].mxu1 %v652_v43 }
 0x192   :  { %1393 = vmatpush3.bf16.msra.mxu1 %v1646_v45  ;;  %1059 = vmatprep.mubr.bf16.mxu1 %v651_v24 }
 0x193   :  { %1394 = vmatprep.subr.bf16.mxu1 %v1647_v48  ;;  %1488 = vmatpush3.bf16.msra.mxu0 %v1487_v13 }
 0x194   :  { %1489 = vmatprep.subr.bf16.mxu0 %v1785_v1  ;;  %v1382_v1 = vld [vmem:[%s2036_s4] ss:$0 sm:$0xff] }
 0x196   :  { %1395 = vmatpush3.bf16.msra.mxu1 %v1648_v49 }
 0x197   :  { %1396 = vmatprep.subr.bf16.mxu1 %v1649_v51  ;;  %1491 = vmatpush3.bf16.msra.mxu0 %v1490_v18 }
 0x19a   :  { %1397 = vmatpush3.bf16.msra.mxu1 %v1650_v52 }
 0x19b   :  { %1398 = vmatprep.subr.bf16.mxu1 %v1651_v54 }
 0x19e   :  { %1399 = vmatpush3.bf16.msra.mxu1 %v1652_v56 }
 0x19f   :  { %1400 = vmatprep.subr.bf16.mxu1 %v1653_v57 }
 0x1a2   :  { %1401 = vmatpush3.bf16.msra.mxu1 %v1654_v59 }
 0x1a3   :  { %1402 = vmatprep.subr.bf16.mxu1 %v1655_v61 }
 0x1a6   :  { %1403 = vmatpush3.bf16.msra.mxu1 %v1656_v62 }
 0x1a9   :  { %1060 = vmatmul.mubr.bf16.vlgmr.msra.gmra.mrb[8].mxu1 %v650_v22 }
 0x1aa   :  { %1067 = vmatprep.mubr.bf16.mxu1 %v653_v44 }
 0x1b1   :  { %1068 = vmatmul.mubr.bf16.gmra.mrb[12].mxu1 %v652_v43 }
 0x25c   :  { %v1008_v19 = vpop.f32.mrb[0].mxu1 }
 0x25d   :  { %v1081_v20 = vrot.slane %v1008_v19, 7  ;;  %v1010_v21 = vpop.f32.mrb[1].mxu1 }
 0x25e   :  { %v1012_v22 = vpop.f32.mrb[2].mxu1 }
 0x25f   :  { %v1092_v23 = vsel %vm170_vm5, 0.0, %v1081_v20  ;;  %v1082_v24 = vrot.slane %v1012_v22, 7  ;;  %v1014_v26 = vpop.f32.mrb[3].mxu1 }
 0x260   :  { %v1093_v27 = vsel %vm1906_vm2, 0.0, %v1092_v23  ;;  %vm1183_vm2 = vcmask 1041409  }
 0x261   :  { %v1097_v25 = vadd.f32 %v1093_v27, %v1010_v21  ;;  %v1083_v28 = vsel %vm170_vm5, %v1081_v20, %v1082_v24 }
 0x262   :  { %v1098_v29 = vadd.f32 %v1083_v28, %v1014_v26 }
 0x264   :  { %v1018_v30 = vpop.f32.mrb[4].mxu1 }
 0x265   :  { %v1084_v31 = vrot.slane %v1018_v30, 7  ;;  %v1020_v32 = vpop.f32.mrb[5].mxu1 }
 0x266   :  { %v1022_v33 = vpop.f32.mrb[6].mxu1 }
 0x267   :  { %v1085_v34 = vsel %vm170_vm5, %v1082_v24, %v1084_v31  ;;  %v1086_v35 = vrot.slane %v1022_v33, 7  ;;  %v1024_v36 = vpop.f32.mrb[7].mxu1 }
 0x268   :  { %v1095_v39 = vsel %vm1920_vm6, 0.0, %v1085_v34 }
 0x269   :  { %v1099_v40 = vadd.f32 %v1095_v39, %v1020_v32  ;;  %v1087_v41 = vsel %vm170_vm5, %v1084_v31, %v1086_v35 }
 0x26a   :  { %v1100_v38 = vadd.f32 %v1087_v41, %v1024_v36 }
 0x27c   :  { %v1404_v43 = vpop.f32.mrb[8].mxu1 }
 0x27d   :  { %v1405_v44 = vpop.f32.mrb[9].mxu1 }
 0x27e   :  { %v1406_v45 = vadd.f32 %v1405_v44, %v1404_v43  ;;  %v1407_v48 = vpop.f32.mrb[10].mxu1 }
 0x27f   :  { %v1408_v49 = vpop.f32.mrb[11].mxu1 }
 0x280   :  { %v1409_v51 = vadd.f32 %v1408_v49, %v1407_v48  ;;  %v1106_v52 = vrot.slane %v1406_v45, 1 }
 0x282   :  { %v1107_v54 = vrot.slane %v1409_v51, 1 }
 0x284   :  { %v1108_v56 = vsel %vm1105_vm0, %v1106_v52, %v1107_v54  ;;  %v1410_v57 = vpop.f32.mrb[12].mxu1 }
 0x285   :  { %v1122_v59 = vadd.f32 %v1108_v56, %v1097_v25  ;;  %v1411_v61 = vpop.f32.mrb[13].mxu1 }
 0x286   :  { %v1412_v50 = vadd.f32 %v1411_v61, %v1410_v57  ;;  %v1413_v62 = vpop.f32.mrb[14].mxu1 }
 0x287   :  { %v1414_v46 = vpop.f32.mrb[15].mxu1  ;;  %v1133_v3 = vadd.f32 %v1382_v1, %v1122_v59 }
 0x288   :  { %v1109_v63 = vrot.slane %v1412_v50, 1  ;;  %v1415_v0 = vadd.f32 %v1414_v46, %v1413_v62 }
 0x289   :  { %v1137_v8 = vmax.f32 %v1133_v3, 0.0 }
 0x28a   :  { %v1110_v15 = vsel %vm1105_vm0, %v1107_v54, %v1109_v63  ;;  %v1111_v37 = vrot.slane %v1415_v0, 1 }
 0x28b   :  { %v1119_v2 = vsel %vm1964_vm11, 0.0, %v1110_v15 }
 0x28c   :  { %v1123_v4 = vadd.f32 %v1119_v2, %v1098_v29  ;;  %v1112_v5 = vsel %vm1105_vm0, %v1109_v63, %v1111_v37  ;;  %v1117_v6 = vsel %vm1105_vm0, %v1111_v37, 0.0  ;;  %v1383_v29 = vld [vmem:[%s2038_s6] ss:$0 sm:$0xff] }
 0x28d   :  { %v1121_v7 = vsel %vm1975_vm13, 0.0, %v1117_v6  ;;  %v1124_v53 = vadd.f32 %v1112_v5, %v1099_v40 }
 0x28e   :  { %v1134_v47 = vadd.f32 %v1382_v1, %v1123_v4  ;;  %v1125_v55 = vadd.f32 %v1121_v7, %v1100_v38 }
 0x28f   :  { %v1135_v58 = vadd.f32 %v1382_v1, %v1124_v53 }
 0x290   :  { %v1138_v9 = vmax.f32 %v1134_v47, 0.0  ;;  %v1136_v10 = vadd.f32 %v1382_v1, %v1125_v55 }
 0x291   :  { %v1139_v11 = vmax.f32 %v1135_v58, 0.0 }
 0x292   :  { %v1141_v12 = vadd.f32 %v1138_v9, %v1137_v8  ;;  %v1140_v42 = vmax.f32 %v1136_v10, 0.0 }
 0x294   :  { %v1142_v13 = vrot.slane %v1141_v12, 4  ;;  %v1148_v14 = vadd.f32 %v1140_v42, %v1139_v11 }
 0x296   :  { %v1143_v16 = vadd.f32 %v1142_v13, %v1141_v12  ;;  %v1149_v17 = vrot.slane %v1148_v14, 4 }
 0x298   :  { %v1150_v18 = vadd.f32 %v1149_v17, %v1148_v14  ;;  %v1144_v19 = vrot.slane %v1143_v16, 2 }
 0x29a   :  { %v1151_v20 = vrot.slane %v1150_v18, 2  ;;  %v1145_v21 = vadd.f32 %v1144_v19, %v1143_v16 }
 0x29c   :  { %v1146_v60 = vrot.slane %v1145_v21, 1  ;;  %v1152_v22 = vadd.f32 %v1151_v20, %v1150_v18 }
 0x29e   :  { %v1147_v23 = vadd.f32 %v1146_v60, %v1145_v21  ;;  %v1153_v24 = vrot.slane %v1152_v22, 1 }
 0x2a0   :  { %v1154_v26 = vadd.f32 %v1153_v24, %v1152_v22  ;;  %v1156_v27 = vmul.f32 0.0625, %v1147_v23 }
 0x2a2   :  { %v1157_v25 = vmul.f32 0.0625, %v1154_v26 }
 0x2a4   :  { %v1184_v28 = vsel %vm1183_vm2, %v1157_v25, %v1156_v27 }
 0x2a5   :  { %1466 = vmatmul.mubr.f32.vlgmr.msra.gmra.mrb[8].mxu0 %v1184_v28 }
 0x378   :  { %v1252_v30 = vpop.f32.mrb[8].mxu0 }
 0x379   :  { %v1253_v31 = vadd.f32 %v1383_v29, %v1252_v30  ;;  %v1467_v32 = vpop.f32.mrb[9].mxu0 }
 0x37b   :  { %1256 = vst [vmem:[#allocation10] sm:$0x3] %v1253_v31 }
 0x37c   :  { %1756 = shalt.err (!%p1753_p8)
}
 0x37d   :  { %s1757_s12 = scalar_lea.hbm %s2039_s7, 32 }
 0x37e   :  { %p1758_p9 = scmp.ne.s32.totalorder %s2039_s7, %s1757_s12  ;;  %p1761_p10 = scmp.lt.u32.totalorder %s1757_s12, %s2039_s7 }
 0x380   :  { %p1763_p11 = pnand %p1761_p10, %p1758_p9 }
 0x382   :  { %1766 = shalt.err (!%p1763_p11)
}
 0x383   :  { %1266 = dma.vmem_to_hbm [thread:$0]  %s1264_s8, 32, %s2039_s7, [#allocation4]  }
 0x384   :  { %1773 = dma.done.wait [#allocation4], 32  }
 0x385   :  { %1774 = vsyncadd [#allocation4], 4294967264 }
 0x386   :  { %1270 = vsyncpa [#allocation3], 1 }
 0x387   :  { %1271 = vsyncpa [#allocation6], 1 }
 0x388   :  { %1272 = vsyncpa [#allocation9], 1 }
 0x389   :  { %1273 = vsyncpa [#allocation4], 1 }

</bundles_post_ra>
